<compile_context>
chip_gen: v7x
topology: tpu7x:2x2x1
jax: 0.10.0
libtpu: 0.0.40
codegen_flags: <defaults>
</compile_context>

<pallas_src>
import numpy as np
import jax
import jax.numpy as jnp
from jax.experimental import pallas as pl
from jax.experimental.pallas import tpu as pltpu


def _round_up(x: int, m: int) -> int:
    return (x + m - 1) // m * m


# ------------------------------------------------------------------ BCE sum

_BLOCK_ELEMS = 512 * 1024        # ~2 MiB f32 per input block per buffer


def _make_bce_kernel(n: int, lane: int, row_tile: int, kp: int):
    """BCE-sum kernel factory.  grid = (P, Kp): axis 0 "parallel" (row
    groups, one partial per group), axis 1 "arbitrary" (reduction)."""
    row_full = n // lane          # number of fully-valid rows
    rem = n % lane                # valid lanes in the first partial row

    def kernel(x_ref, t_ref, out_ref, acc_ref):
        pi = pl.program_id(0)
        ki = pl.program_id(1)

        @pl.when(ki == 0)
        def _():
            acc_ref[...] = jnp.zeros_like(acc_ref)

        # Element-granular validity mask from the UNCLAMPED global block
        # index: covers (a) the partial trailing row block Pallas pads with
        # undefined data, (b) duplicated clamped blocks from the megacore
        # split, (c) any sub-row tail when n % lane != 0.  jnp.where
        # (select) discards NaN/Inf garbage from the padded region.
        bi = pi * kp + ki
        grow = bi * row_tile + jax.lax.broadcasted_iota(
            jnp.int32, (row_tile, lane), 0)
        lidx = jax.lax.broadcasted_iota(jnp.int32, (row_tile, lane), 1)
        mask = (grow < row_full) | ((grow == row_full) & (lidx < rem))

        x = x_ref[...].astype(jnp.float32)
        t = t_ref[...].astype(jnp.float32)
        # PyTorch F.binary_cross_entropy clamps log terms at -100.
        log_x = jnp.maximum(jnp.log(x), -100.0)
        log_1mx = jnp.maximum(jnp.log(1.0 - x), -100.0)
        bce = -(t * log_x + (1.0 - t) * log_1mx)

        acc_ref[...] += jnp.where(mask, bce, 0.0)      # pure VPU per step

        @pl.when(ki == pl.num_programs(1) - 1)
        def _():
            out_ref[...] = jnp.full(out_ref.shape, jnp.sum(acc_ref[...]),
                                    jnp.float32)

    return kernel


def bce_sum(x_recon, x_target):
    """sum(BCE(x_recon, x_target)) over every element, tiled & pipelined,
    with no host-side padding of the inputs (zero-copy flat reshape)."""
    n = int(np.prod(x_recon.shape))
    xf = x_recon.reshape(-1)
    tf = x_target.reshape(-1)

    lane = None
    for cand in (512, 256, 128):
        if n % cand == 0:
            lane = cand
            break
    if lane is None:
        # TODO(synk): ragged n (not a multiple of 128) — this tiny tail pad
        # still copies the whole array; a manual-DMA (pl.ANY) path would
        # avoid it, not worth the complexity for this degenerate case.
        lane = 128
        pad = _round_up(n, lane) - n
        xf = jnp.pad(xf, (0, pad), constant_values=1.0)
        tf = jnp.pad(tf, (0, pad), constant_values=1.0)

    total_len = int(xf.shape[0])
    rows = total_len // lane
    x2 = xf.reshape(rows, lane)          # zero-copy (contiguous)
    t2 = tf.reshape(rows, lane)

    row_tile_max = max(8, _BLOCK_ELEMS // lane)     # ~2 MiB f32 per block
    if rows <= row_tile_max:
        row_tile = rows                  # full-extent block (no 8-divisibility needed)
    else:
        row_tile = row_tile_max          # multiple of 8 by construction

    rb = -(-rows // row_tile)            # number of row blocks
    # 2-way split of row blocks: feeds both v7x TensorCores whenever there
    # are >= 2 blocks; on single-TC v5e/v6e the "parallel" axis is just a
    # harmless serial outer loop.
    p = 2 if rb >= 2 else 1
    kp = -(-rb // p)

    def in_map(pi, ki):
        # Clamp so the block stays in bounds; the duplicated block for the
        # last core (when rb is odd) is fully masked inside the kernel.
        return (jnp.minimum(pi * kp + ki, rb - 1), 0)

    in_bytes = (jnp.dtype(x_recon.dtype).itemsize
                + jnp.dtype(x_target.dtype).itemsize)
    cost = pl.CostEstimate(flops=6 * n,
                           transcendentals=2 * n,
                           bytes_accessed=n * in_bytes + p * 8 * 128 * 4)

    partials = pl.pallas_call(
        _make_bce_kernel(n, lane, row_tile, kp),
        out_shape=jax.ShapeDtypeStruct((p, 8, 128), jnp.float32),
        grid_spec=pltpu.PrefetchScalarGridSpec(
            num_scalar_prefetch=0,
            grid=(p, kp),
            in_specs=[
                pl.BlockSpec((row_tile, lane), in_map),
                pl.BlockSpec((row_tile, lane), in_map),
            ],
            out_specs=pl.BlockSpec((1, 8, 128), lambda pi, ki: (pi, 0, 0)),
            scratch_shapes=[pltpu.VMEM((row_tile, lane), jnp.float32)],
        ),
        compiler_params=pltpu.CompilerParams(
            dimension_semantics=("parallel", "arbitrary"),
            vmem_limit_bytes=32 * 1024 * 1024,
        ),
        cost_estimate=cost,
    )(x2, t2)
    # One scalar per parallel group, broadcast over its (8,128) tile.
    return jnp.sum(partials[:, 0, 0])


# -------------------------------------------- fused KL + hierarchy penalty

def _make_latent_kernel(dims, batch, b_tile, free_bits, corr_pairs):
    num_levels = len(dims)
    pair_slot = {pair: num_levels + j for j, pair in enumerate(corr_pairs)}

    def kernel(*refs):
        mu_refs = refs[:num_levels]
        lv_refs = refs[num_levels:2 * num_levels]
        out_ref = refs[2 * num_levels]

        kb = pl.program_id(0)

        @pl.when(kb == 0)
        def _():
            out_ref[...] = jnp.zeros_like(out_ref)

        # Rows valid in this batch tile (last block may be partial; Pallas
        # pads its reads with undefined data which we mask below).
        valid = jnp.minimum(batch - kb * b_tile, b_tile)
        rmask = (jax.lax.broadcasted_iota(jnp.int32, (b_tile, 1), 0) < valid)

        stats = []        # (output lane slot, partial sum for this tile)
        prev_mu = None
        for i in range(num_levels):
            mu = mu_refs[i][...].astype(jnp.float32)
            lv = lv_refs[i][...].astype(jnp.float32)

            kl = -0.5 * jnp.sum(1.0 + lv - mu * mu - jnp.exp(lv),
                                axis=1, keepdims=True)       # (b_tile, 1)
            if free_bits > 0.0:
                kl = jnp.maximum(kl, jnp.float32(free_bits * float(dims[i])))
            # Mask AFTER the free-bits clamp: padded rows must contribute 0.
            stats.append((i, jnp.sum(jnp.where(rmask, kl, 0.0))))

            if prev_mu is not None and (i - 1, i) in pair_slot:
                corr = jnp.sum(prev_mu * mu, axis=1, keepdims=True)
                stats.append((pair_slot[(i - 1, i)],
                              jnp.sum(jnp.where(rmask, corr, 0.0))))
            prev_mu = mu          # only two levels' mu tiles live at once

        # Pack this tile's scalar partials into lanes [0, n_out) of row 0
        # and accumulate into the revisited VMEM output block.
        lane = jax.lax.broadcasted_iota(jnp.int32, (8, 128), 1)
        srow = jax.lax.broadcasted_iota(jnp.int32, (8, 128), 0)
        step_vec = jnp.zeros((8, 128), jnp.float32)
        for slot, s in stats:
            step_vec = step_vec + jnp.where((srow == 0) & (lane == slot),
                                            s, jnp.float32(0.0))
        out_ref[...] += step_vec

    return kernel


def latent_stats(latent_params, free_bits, hierarchy_penalty):
    """All per-level KL means + hierarchy correlations in ONE pallas_call,
    batch-tiled, with every level at its natural (B, d_i) shape."""
    num_levels = len(latent_params)
    batch = int(latent_params[0]["mu"].shape[0])
    dims = [int(p["mu"].shape[1]) for p in latent_params]

    corr_pairs = []
    if hierarchy_penalty > 0.0 and num_levels >= 2:
        corr_pairs = [(i, i + 1) for i in range(num_levels - 1)
                      if dims[i] == dims[i + 1]]
    n_out = num_levels + len(corr_pairs)
    assert n_out <= 128, "too many output stats for one vreg row"

    # Batch tile: <= 512 rows, shrunk so double-buffered inputs stay ~16 MiB.
    bytes_per_row = 2 * 4 * sum(dims)            # mu + logvar, f32
    b_tile = min(batch, 512)
    while b_tile > 8 and 2 * b_tile * bytes_per_row > 16 * 1024 * 1024:
        b_tile //= 2
    if b_tile < batch:
        b_tile = min(_round_up(b_tile, 8), batch)
    if b_tile >= batch:
        b_tile = batch                            # full extent, no masking needed
    kb = -(-batch // b_tile)

    inputs = ([p["mu"] for p in latent_params]
              + [p["logvar"] for p in latent_params])
    level_specs = [pl.BlockSpec((b_tile, dims[i]), lambda k: (k, 0))
                   for i in range(num_levels)]
    in_specs = level_specs + level_specs         # mu specs then logvar specs

    out = pl.pallas_call(
        _make_latent_kernel(dims, batch, b_tile, free_bits, corr_pairs),
        out_shape=jax.ShapeDtypeStruct((8, 128), jnp.float32),
        grid_spec=pltpu.PrefetchScalarGridSpec(
            num_scalar_prefetch=0,
            grid=(kb,),
            in_specs=in_specs,
            out_specs=pl.BlockSpec((8, 128), lambda k: (0, 0)),
        ),
        compiler_params=pltpu.CompilerParams(
            dimension_semantics=("arbitrary",),
            vmem_limit_bytes=48 * 1024 * 1024,
        ),
    )(*inputs)

    inv_b = jnp.float32(1.0 / batch)
    kl_losses = [out[0, i] * inv_b for i in range(num_levels)]
    corrs = [out[0, num_levels + j] * inv_b for j in range(len(corr_pairs))]
    return kl_losses, corrs


# ------------------------------------------------------------------ module

class HierarchicalLossPallas:
    """JAX/Pallas port of the PyTorch HierarchicalLoss forward pass."""

    def __init__(self, num_levels: int, beta_schedule: str = "constant",
                 free_bits: float = 0.0, hierarchy_penalty: float = 0.0):
        self.num_levels = num_levels
        self.beta_schedule = beta_schedule
        self.free_bits = float(free_bits)
        self.hierarchy_penalty = float(hierarchy_penalty)
        self.betas = np.ones((num_levels,), dtype=np.float32)

    def update_beta_schedule(self, epoch: int, warmup_epochs: int = 100):
        # Host-side scalar schedule (mirrors the PyTorch buffer update).
        if self.beta_schedule == "linear":
            self.betas[:] = min(1.0, epoch / warmup_epochs)
        elif self.beta_schedule == "cyclical":
            cycle_length = 100
            self.betas[:] = 0.5 * (1 + np.cos(
                2 * np.pi * (epoch % cycle_length) / cycle_length))
        elif self.beta_schedule == "hierarchical":
            for i in range(self.num_levels):
                self.betas[i] = ((i + 1) / self.num_levels
                                 * min(1.0, epoch / warmup_epochs))

    def compute_reconstruction_loss(self, x_recon, x_target):
        b = x_target.shape[0]
        # TODO(synk): if pre-sigmoid logits were available, a BCE-with-logits
        # form would drop one EUP log per element and the upstream sigmoid
        # pass (main win on v7x where EUP is the saturating slot); the module
        # interface only provides the post-sigmoid reconstruction.
        return bce_sum(x_recon, x_target) / jnp.float32(b)

    def __call__(self, model_outputs, targets, epoch: int = 0):
        reconstruction = model_outputs["reconstruction"]
        latent_params = model_outputs["latent_params"]

        recon_loss = self.compute_reconstruction_loss(reconstruction, targets)

        kl_losses, corrs = latent_stats(latent_params, self.free_bits,
                                        self.hierarchy_penalty)
        total_kl = jnp.float32(0.0)
        for i, kl_loss in enumerate(kl_losses):
            total_kl = total_kl + jnp.float32(self.betas[i]) * kl_loss

        hierarchy_penalty = jnp.float32(0.0)
        if self.hierarchy_penalty > 0.0 and len(latent_params) >= 2:
            penalty = jnp.float32(0.0)
            for corr in corrs:
                penalty = penalty + corr ** 2
            hierarchy_penalty = jnp.float32(self.hierarchy_penalty) * penalty

        total_loss = recon_loss + total_kl + hierarchy_penalty
        return {
            "total_loss": total_loss,
            "reconstruction_loss": recon_loss,
            "kl_losses": kl_losses,
            "total_kl": total_kl,
            "hierarchy_penalty": hierarchy_penalty,
        }


# ---------------------------------------------------------------- reference

def _reference(model_outputs, targets, free_bits, hierarchy_penalty, betas):
    b = targets.shape[0]
    xr = model_outputs["reconstruction"].reshape(b, -1).astype(jnp.float32)
    xt = targets.reshape(b, -1).astype(jnp.float32)
    bce = -(xt * jnp.maximum(jnp.log(xr), -100.0)
            + (1.0 - xt) * jnp.maximum(jnp.log(1.0 - xr), -100.0))
    recon = jnp.sum(bce) / b

    total_kl = 0.0
    for i, p in enumerate(model_outputs["latent_params"]):
        mu, lv = p["mu"].astype(jnp.float32), p["logvar"].astype(jnp.float32)
        kl = -0.5 * jnp.sum(1.0 + lv - mu ** 2 - jnp.exp(lv), axis=1)
        if free_bits > 0:
            kl = jnp.maximum(kl, free_bits * mu.shape[1])
        total_kl = total_kl + betas[i] * jnp.mean(kl)

    pen = 0.0
    lps = model_outputs["latent_params"]
    if hierarchy_penalty > 0 and len(lps) >= 2:
        for i in range(len(lps) - 1):
            m1, m2 = lps[i]["mu"], lps[i + 1]["mu"]
            if m1.shape[1] == m2.shape[1]:
                corr = jnp.mean(jnp.sum(m1 * m2, axis=1))
                pen = pen + corr ** 2
        pen = hierarchy_penalty * pen
    return recon + total_kl + pen


# -------------------------------------------------------------------- main

if __name__ == "__main__":
    key = jax.random.PRNGKey(0)
    B, C, H, W = 2, 4, 16, 16
    latent_dims = [32, 32, 16]          # levels 0 & 1 share dim -> penalty term

    k_rec, k_tgt, *k_lat = jax.random.split(key, 2 + 2 * len(latent_dims))

    reconstruction = jax.nn.sigmoid(
        jax.random.normal(k_rec, (B, C, H, W), dtype=jnp.float32))
    targets = jax.random.uniform(k_tgt, (B, C, H, W), dtype=jnp.float32)

    latent_params = []
    for lvl, d in enumerate(latent_dims):
        mu = jax.random.normal(k_lat[2 * lvl], (B, d), dtype=jnp.float32) * 0.5
        logvar = jax.random.normal(k_lat[2 * lvl + 1], (B, d),
                                   dtype=jnp.float32) * 0.1
        latent_params.append({"mu": mu, "logvar": logvar})

    model_outputs = {"reconstruction": reconstruction,
                     "latent_params": latent_params}

    loss_fn = HierarchicalLossPallas(num_levels=len(latent_dims),
                                     beta_schedule="constant",
                                     free_bits=0.1,
                                     hierarchy_penalty=0.1)

    out = loss_fn(model_outputs, targets, epoch=0)
    jax.block_until_ready(out["total_loss"])

    ref_total = _reference(model_outputs, targets,
                           free_bits=0.1, hierarchy_penalty=0.1,
                           betas=np.ones(len(latent_dims), dtype=np.float32))
    np.testing.assert_allclose(np.asarray(out["total_loss"]),
                               np.asarray(ref_total), rtol=1e-4, atol=1e-3)

    print("KERNEL_OK")
</pallas_src>

<mosaic_0001>
module attributes {stable_mosaic.version = 11 : i64} {
  func.func @kernel(%arg0: i32, %arg1: i32, %arg2: memref<4x512xf32, #tpu.memory_space<vmem>>, %arg3: memref<4x512xf32, #tpu.memory_space<vmem>>, %arg4: memref<1x8x128xf32, #tpu.memory_space<vmem>>, %arg5: memref<4x512xf32, #tpu.memory_space<vmem>>) attributes {dimension_semantics = [#tpu.dimension_semantics<parallel>, #tpu.dimension_semantics<arbitrary>], iteration_bounds = array<i64: 1, 1>, scalar_prefetch = 0 : i64, scratch_operands = 1 : i64, tpu.core_type = #tpu.core_type<tc>, window_params = [{transform_indices = @transform_0, window_bounds = array<i64: 4, 512>}, {transform_indices = @transform_1, window_bounds = array<i64: 4, 512>}, {transform_indices = @transform_2, window_bounds = array<i64: 1, 8, 128>}]} {
    %c0_i32 = arith.constant 0 : i32
    %0 = arith.cmpi eq, %arg1, %c0_i32 : i32
    %1 = arith.extui %0 : i1 to i32
    %c0_i32_0 = arith.constant 0 : i32
    %2 = arith.cmpi ne, %1, %c0_i32_0 : i32
    scf.if %2 {
      %cst_18 = arith.constant 0.000000e+00 : f32
      %43 = vector.broadcast %cst_18 : f32 to vector<4x512xf32>
      %c0_19 = arith.constant 0 : index
      %c0_20 = arith.constant 0 : index
      %44 = vector.load %arg5[%c0_19, %c0_20] : memref<4x512xf32, #tpu.memory_space<vmem>>, vector<4x512xf32>
      tpu.vector_store %arg5[%c0_19, %c0_20], %43 {strides = array<i32>} : memref<4x512xf32, #tpu.memory_space<vmem>>, vector<4x512xf32>,
    } else {
    }
    %c1_i32 = arith.constant 1 : i32
    %3 = arith.muli %arg0, %c1_i32 : i32
    %4 = arith.addi %3, %arg1 : i32
    %c4_i32 = arith.constant 4 : i32
    %5 = arith.muli %4, %c4_i32 : i32
    %6 = tpu.iota {dimensions = array<i32: 0>} : vector<4x512xi32>
    %7 = vector.broadcast %5 : i32 to vector<4x512xi32>
    %8 = arith.addi %7, %6 : vector<4x512xi32>
    %9 = tpu.iota {dimensions = array<i32: 1>} : vector<4x512xi32>
    %c4_i32_1 = arith.constant 4 : i32
    %10 = vector.broadcast %c4_i32_1 : i32 to vector<4x512xi32>
    %11 = arith.cmpi slt, %8, %10 : vector<4x512xi32>
    %c4_i32_2 = arith.constant 4 : i32
    %12 = vector.broadcast %c4_i32_2 : i32 to vector<4x512xi32>
    %13 = arith.cmpi eq, %8, %12 : vector<4x512xi32>
    %c0_i32_3 = arith.constant 0 : i32
    %14 = vector.broadcast %c0_i32_3 : i32 to vector<4x512xi32>
    %15 = arith.cmpi slt, %9, %14 : vector<4x512xi32>
    %16 = arith.andi %13, %15 : vector<4x512xi1>
    %17 = arith.ori %11, %16 : vector<4x512xi1>
    %c0 = arith.constant 0 : index
    %c0_4 = arith.constant 0 : index
    %18 = vector.load %arg2[%c0, %c0_4] : memref<4x512xf32, #tpu.memory_space<vmem>>, vector<4x512xf32>
    %c0_5 = arith.constant 0 : index
    %c0_6 = arith.constant 0 : index
    %19 = vector.load %arg3[%c0_5, %c0_6] : memref<4x512xf32, #tpu.memory_space<vmem>>, vector<4x512xf32>
    %20 = math.log %18 : vector<4x512xf32>
    %cst = arith.constant -1.000000e+02 : f32
    %21 = vector.broadcast %cst : f32 to vector<4x512xf32>
    %22 = arith.maximumf %20, %21 : vector<4x512xf32>
    %cst_7 = arith.constant 1.000000e+00 : f32
    %23 = vector.broadcast %cst_7 : f32 to vector<4x512xf32>
    %24 = arith.subf %23, %18 : vector<4x512xf32>
    %25 = math.log %24 : vector<4x512xf32>
    %cst_8 = arith.constant -1.000000e+02 : f32
    %26 = vector.broadcast %cst_8 : f32 to vector<4x512xf32>
    %27 = arith.maximumf %25, %26 : vector<4x512xf32>
    %28 = arith.mulf %19, %22 : vector<4x512xf32>
    %cst_9 = arith.constant 1.000000e+00 : f32
    %29 = vector.broadcast %cst_9 : f32 to vector<4x512xf32>
    %30 = arith.subf %29, %19 : vector<4x512xf32>
    %31 = arith.mulf %30, %27 : vector<4x512xf32>
    %32 = arith.addf %28, %31 : vector<4x512xf32>
    %cst_10 = arith.constant 0.000000e+00 : f32
    %33 = vector.broadcast %cst_10 : f32 to vector<4x512xf32>
    %34 = arith.subf %33, %32 : vector<4x512xf32>
    %c0_11 = arith.constant 0 : index
    %c0_12 = arith.constant 0 : index
    %35 = vector.load %arg5[%c0_11, %c0_12] : memref<4x512xf32, #tpu.memory_space<vmem>>, vector<4x512xf32>
    %cst_13 = arith.constant 0.000000e+00 : f32
    %36 = vector.broadcast %cst_13 : f32 to vector<4x512xf32>
    %37 = arith.select %17, %34, %36 : vector<4x512xi1>, vector<4x512xf32>
    %38 = arith.addf %35, %37 : vector<4x512xf32>
    %c0_14 = arith.constant 0 : index
    %c0_15 = arith.constant 0 : index
    %39 = vector.load %arg5[%c0_14, %c0_15] : memref<4x512xf32, #tpu.memory_space<vmem>>, vector<4x512xf32>
    tpu.vector_store %arg5[%c0_14, %c0_15], %38 {strides = array<i32>} : memref<4x512xf32, #tpu.memory_space<vmem>>, vector<4x512xf32>,
    %c0_i32_16 = arith.constant 0 : i32
    %40 = arith.cmpi eq, %arg1, %c0_i32_16 : i32
    %41 = arith.extui %40 : i1 to i32
    %c0_i32_17 = arith.constant 0 : i32
    %42 = arith.cmpi ne, %41, %c0_i32_17 : i32
    scf.if %42 {
      %c0_18 = arith.constant 0 : index
      %c0_19 = arith.constant 0 : index
      %43 = vector.load %arg5[%c0_18, %c0_19] : memref<4x512xf32, #tpu.memory_space<vmem>>, vector<4x512xf32>
      %44 = vector.shape_cast %43 : vector<4x512xf32> to vector<1x4x512xf32>
      %cst_20 = arith.constant dense<0.000000e+00> : vector<1xf32>
      %45 = vector.multi_reduction <add>, %44, %cst_20 [1, 2] : vector<1x4x512xf32> to vector<1xf32>
      %46 = vector.shape_cast %45 : vector<1xf32> to vector<1x1x1xf32>
      %47 = vector.extract %46[0, 0, 0] : f32 from vector<1x1x1xf32>
      %48 = vector.broadcast %47 : f32 to vector<1x8x128xf32>
      %c0_21 = arith.constant 0 : index
      %c0_22 = arith.constant 0 : index
      %c0_23 = arith.constant 0 : index
      %49 = vector.load %arg4[%c0_21, %c0_22, %c0_23] : memref<1x8x128xf32, #tpu.memory_space<vmem>>, vector<1x8x128xf32>
      tpu.vector_store %arg4[%c0_21, %c0_22, %c0_23], %48 {strides = array<i32>} : memref<1x8x128xf32, #tpu.memory_space<vmem>>, vector<1x8x128xf32>,
    } else {
    }
    return
  }
  func.func @transform_0(%arg0: i32, %arg1: i32) -> (i32, i32) {
    %c1_i32 = arith.constant 1 : i32
    %0 = arith.muli %arg0, %c1_i32 : i32
    %1 = arith.addi %0, %arg1 : i32
    %c0_i32 = arith.constant 0 : i32
    %2 = arith.minsi %1, %c0_i32 : i32
    %c0_i32_0 = arith.constant 0 : i32
    %c0_i32_1 = arith.constant 0 : i32
    return %2, %c0_i32_0 : i32, i32
  }
  func.func @transform_1(%arg0: i32, %arg1: i32) -> (i32, i32) {
    %c1_i32 = arith.constant 1 : i32
    %0 = arith.muli %arg0, %c1_i32 : i32
    %1 = arith.addi %0, %arg1 : i32
    %c0_i32 = arith.constant 0 : i32
    %2 = arith.minsi %1, %c0_i32 : i32
    %c0_i32_0 = arith.constant 0 : i32
    %c0_i32_1 = arith.constant 0 : i32
    return %2, %c0_i32_0 : i32, i32
  }
  func.func @transform_2(%arg0: i32, %arg1: i32) -> (i32, i32, i32) {
    %c0_i32 = arith.constant 0 : i32
    %c0_i32_0 = arith.constant 0 : i32
    %c0_i32_1 = arith.constant 0 : i32
    return %arg0, %c0_i32, %c0_i32_0 : i32, i32, i32
  }
}

</mosaic_0001>

<bundles_post_ra>
// kernel: tpu_custom_call.1
= control target key start
LH: loop header
LB: loop body
LE: loop exit
PB: predicated region body
PF: predicated region fallthrough
CT: control target
= control target key end

     0   :  { %7 = vsyncpa [#allocation4], 0  ;;  %s328_s0 = inlined_call_operand.hbm [shape: f32[4,512], index: 0, kind: input, shape index: {}]   ;;  %s329_s1 = inlined_call_operand.hbm [shape: f32[4,512], index: 1, kind: input, shape index: {}]   ;;  %s330_s2 = inlined_call_operand.hbm [shape: f32[1,8,128], index: 2, kind: output, shape index: {}]  }
   0x1   :  { %8 = vsyncpa [#allocation7], 0 }
   0x2   :  { %9 = vsyncpa [#allocation5], 0  ;;  %s274_s9 = smov [#allocation3]   ;;  %s275_s11 = smov [#allocation6]  }
   0x3   :  { %s22_s10 = sshll.u32 %s274_s9, 4  ;;  %s38_s12 = sshll.u32 %s275_s11, 4  ;;  %s23_s10 = int_to_ptr.vmem [resolvable:$true] %s22_s10  ;;  %s39_s12 = int_to_ptr.vmem [resolvable:$true] %s38_s12 }
   0x4   :  { %s202_s15 = scalar_lea.hbm %s328_s0, 256 }
   0x5   :  { %p203_p0 = scmp.ne.s32.totalorder %s328_s0, %s202_s15  ;;  %p206_p1 = scmp.lt.u32.totalorder %s202_s15, %s328_s0 }
   0x7   :  { %p208_p2 = pnand %p206_p1, %p203_p0 }
   0x9   :  { %211 = shalt.err (!%p208_p2)
}
   0xa   :  { %s212_s20 = scalar_lea.vmem %s23_s10, 256  ;;  %p217_p4 = scmp.lt.s32.totalorder %s23_s10, %s23_s10 }
   0xb   :  { %p213_p3 = scmp.ne.s32.totalorder %s23_s10, %s212_s20  ;;  %p218_p5 = scmp.lt.s32.totalorder %s212_s20, %s212_s20 }
   0xd   :  { %p219_p6 = por %p218_p5, %p217_p4 }
   0xf   :  { %p220_p7 = pnand %p219_p6, %p213_p3 }
  0x11   :  { %223 = shalt.err (!%p220_p7)
}
  0x12   :  { %25 = dma.hbm_to_vmem [thread:$0]  %s328_s0, 256, %s23_s10, [#allocation4]  }
  0x13   :  { %s224_s25 = scalar_lea.hbm %s329_s1, 256 }
  0x14   :  { %p225_p8 = scmp.ne.s32.totalorder %s329_s1, %s224_s25  ;;  %p228_p9 = scmp.lt.u32.totalorder %s224_s25, %s329_s1 }
  0x16   :  { %p230_p10 = pnand %p228_p9, %p225_p8 }
  0x18   :  { %233 = shalt.err (!%p230_p10)
}
  0x19   :  { %s234_s30 = scalar_lea.vmem %s39_s12, 256  ;;  %p239_p12 = scmp.lt.s32.totalorder %s39_s12, %s39_s12 }
  0x1a   :  { %p235_p11 = scmp.ne.s32.totalorder %s39_s12, %s234_s30  ;;  %p240_p13 = scmp.lt.s32.totalorder %s234_s30, %s234_s30 }
  0x1c   :  { %p241_p0 = por %p240_p13, %p239_p12 }
  0x1e   :  { %p242_p1 = pnand %p241_p0, %p235_p11 }
  0x20   :  { %245 = shalt.err (!%p242_p1)
}
  0x21   :  { %41 = dma.hbm_to_vmem [thread:$0]  %s329_s1, 256, %s39_s12, [#allocation7]  }
  0x22   :  { %268 = dma.done.wait [#allocation4], 256  }
  0x23   :  { %269 = vsyncadd [#allocation4], 4294967040 }
  0x24   :  { %270 = dma.done.wait [#allocation7], 256  }
  0x25   :  { %271 = vsyncadd [#allocation7], 4294967040  ;;  %v85_v0 = vld [vmem:[#allocation3] sm:$0xff]  ;;  %v86_v1 = vld [vmem:[#allocation3 + $0x8] sm:$0xff]  ;;  %v62_v10 = vlaneseq  ;;  %vm148_vm1 = vcmask 1043456   ;;  %s276_s1 = smov [#allocation8]  }
  0x26   :  { %194 = vlog2.f32 %v85_v0  ;;  %v95_v2 = vsub.f32 1.0, %v85_v0  ;;  %v96_v3 = vsub.f32 1.0, %v86_v1  ;;  %v87_v5 = vld [vmem:[#allocation6] sm:$0xff]  ;;  %v88_v7 = vld [vmem:[#allocation6 + $0x8] sm:$0xff]  ;;  %s173_s4 = sshll.u32 %s276_s1, 4  ;;  %s174_s4 = int_to_ptr.vmem [resolvable:$true] %s173_s4 }
  0x27   :  { %196 = vlog2.f32 %v86_v1  ;;  %v105_v15 = vsub.f32 1.0, %v87_v5  ;;  %v106_v18 = vsub.f32 1.0, %v88_v7  ;;  %v63_v21 = vshrl.u32 %v62_v10, 7  ;;  %s246_s6 = scalar_lea.vmem %s174_s4, 128  ;;  %p251_p3 = scmp.lt.s32.totalorder %s174_s4, %s174_s4 }
  0x28   :  { %198 = vlog2.f32 %v95_v2  ;;  %p247_p2 = scmp.ne.s32.totalorder %s174_s4, %s246_s6  ;;  %p252_p4 = scmp.lt.s32.totalorder %s246_s6, %s246_s6 }
  0x29   :  { %200 = vlog2.f32 %v96_v3  ;;  %vm71_vm0 = vcmp.lt.s32.totalorder %v63_v21, 4 }
  0x2a   :  { %p253_p5 = por %p252_p4, %p251_p3 }
  0x2c   :  { %p254_p6 = pnand %p253_p5, %p247_p2 }
  0x30   :  { %v195_v4 = vpop.eup %194 }
  0x31   :  { %v197_v6 = vpop.eup %196  ;;  %v90_v8 = vmul.f32 0.6931472, %v195_v4 }
  0x32   :  { %v199_v9 = vpop.eup %198  ;;  %v92_v11 = vmul.f32 0.6931472, %v197_v6 }
  0x33   :  { %v201_v12 = vpop.eup %200  ;;  %v93_v13 = vmax.f32 %v90_v8, -100.0  ;;  %v98_v14 = vmul.f32 0.6931472, %v199_v9 }
  0x34   :  { %v94_v16 = vmax.f32 %v92_v11, -100.0  ;;  %v100_v17 = vmul.f32 0.6931472, %v201_v12 }
  0x35   :  { %v101_v19 = vmax.f32 %v98_v14, -100.0  ;;  %v103_v20 = vmul.f32 %v93_v13, %v87_v5 }
  0x36   :  { %v102_v22 = vmax.f32 %v100_v17, -100.0  ;;  %v104_v23 = vmul.f32 %v94_v16, %v88_v7 }
  0x37   :  { %v107_v24 = vmul.f32 %v105_v15, %v101_v19 }
  0x38   :  { %v108_v25 = vmul.f32 %v106_v18, %v102_v22 }
  0x39   :  { %v109_v26 = vadd.f32 %v107_v24, %v103_v20 }
  0x3a   :  { %v110_v27 = vadd.f32 %v108_v25, %v104_v23 }
  0x3b   :  { %v111_v28 = vsub.f32 0.0, %v109_v26 }
  0x3c   :  { %v112_v29 = vsub.f32 0.0, %v110_v27 }
  0x3d   :  { %v117_v30 = vcombine.high %v111_v28, %v111_v28  ;;  %v121_v31 = vsel %vm71_vm0, %v111_v28, 0.0 }
  0x3e   :  { %v118_v32 = vcombine.high %v112_v29, %v112_v29  ;;  %v123_v33 = vsel %vm71_vm0, %v112_v29, 0.0 }
  0x3f   :  { %v122_v34 = vsel %vm71_vm0, %v117_v30, 0.0 }
  0x40   :  { %v124_v35 = vsel %vm71_vm0, %v118_v32, 0.0  ;;  %v129_v36 = vcombine.low %v121_v31, %v122_v34  ;;  %v187_v37 = vcombine.low %v122_v34, %v122_v34 }
  0x41   :  { %v130_v38 = vcombine.low %v123_v33, %v124_v35  ;;  %v188_v39 = vcombine.low %v124_v35, %v124_v35 }
  0x42   :  { %v149_v40 = vsel %vm148_vm1, %v129_v36, 0.0  ;;  %v150_v41 = vsel %vm148_vm1, %v187_v37, 0.0 }
  0x43   :  { %v151_v42 = vadd.f32 %v150_v41, %v149_v40  ;;  %v152_v43 = vsel %vm148_vm1, %v130_v38, 0.0  ;;  %v154_v44 = vsel %vm148_vm1, %v188_v39, 0.0 }
  0x45   :  { %v153_v45 = vadd.f32 %v152_v43, %v151_v42 }
  0x47   :  { %v155_v46 = vadd.f32 %v154_v44, %v153_v45 }
  0x49   :  { %156 = vadd.xlane.f32.xlu0 %v155_v46 }
  0xd6   :  { %v157_v47 = vpop.xlane.xlu0 %156 }
  0xd7   :  { %v158_v48 = vrot.slane %v157_v47, 4 }
  0xd9   :  { %v159_v49 = vadd.f32 %v158_v48, %v157_v47 }
  0xdb   :  { %v160_v50 = vrot.slane %v159_v49, 2 }
  0xdd   :  { %v161_v51 = vadd.f32 %v160_v50, %v159_v49 }
  0xdf   :  { %v162_v52 = vrot.slane %v161_v51, 1 }
  0xe1   :  { %v163_v53 = vadd.f32 %v162_v52, %v161_v51 }
  0xe3   :  { %189 = vpush %v163_v53 }
 0x114   :  { %s190_s5 = spop %189 }
 0x115   :  { %v165_v54 = vstv %s190_s5 }
 0x116   :  { %166 = vst [vmem:[#allocation8] sm:$0xff] %v165_v54 }
 0x117   :  { %257 = shalt.err (!%p254_p6)
}
 0x118   :  { %s258_s9 = scalar_lea.hbm %s330_s2, 128 }
 0x119   :  { %p259_p7 = scmp.ne.s32.totalorder %s330_s2, %s258_s9  ;;  %p262_p8 = scmp.lt.u32.totalorder %s258_s9, %s330_s2 }
 0x11b   :  { %p264_p9 = pnand %p262_p8, %p259_p7 }
 0x11d   :  { %267 = shalt.err (!%p264_p9)
}
 0x11e   :  { %176 = dma.vmem_to_hbm [thread:$0]  %s174_s4, 128, %s330_s2, [#allocation5]  }
 0x11f   :  { %272 = dma.done.wait [#allocation5], 128  }
 0x120   :  { %273 = vsyncadd [#allocation5], 4294967168 }
 0x121   :  { %180 = vsyncpa [#allocation4], 1 }
 0x122   :  { %181 = vsyncpa [#allocation7], 1 }
 0x123   :  { %182 = vsyncpa [#allocation5], 1 }

</bundles_post_ra>
